<compile_context>
chip_gen: v7x
topology: tpu7x:2x2x1
jax: 0.10.0
libtpu: 0.0.40
codegen_flags: <defaults>
</compile_context>

<pallas_src>
import functools

import jax
import jax.numpy as jnp
from jax.experimental import pallas as pl
from jax.experimental.pallas import tpu as pltpu

BN_EPS = 1e-5


def _stacked_conv_matrix(w_oihw, width):
    """3x3 conv (stride 1, pad 1) as ONE (3*W*Cin, W*Cout) banded matmul operator.

    For output row h, the conv is
        out[h] = concat([x[h-1], x[h], x[h+1]], lanes) @ T_stacked
    where out-of-range input rows are zero (handled by roll+mask in the kernel)
    and the width-direction zero padding is folded into T (out-of-range taps
    are zero rows).  Built with where/sum (no dot) so the weights stay exact f32.
    """
    cout, cin, kh, kw = w_oihw.shape
    assert kh == 3 and kw == 3
    w_hwio = jnp.transpose(w_oihw, (2, 3, 1, 0)).astype(jnp.float32)  # (3,3,Cin,Cout)
    win = jnp.arange(width)[None, :, None]          # input column
    wout = jnp.arange(width)[None, None, :]         # output column
    dx = jnp.arange(kw)[:, None, None]
    ind = win == wout + dx - 1                      # (3, W, W) banded indicator
    t = jnp.sum(
        jnp.where(ind[None, :, :, None, :, None],
                  w_hwio[:, :, None, :, None, :], 0.0),
        axis=1)                                     # (3, W, Cin, W, Cout)
    return t.reshape(kh * width * cin, width * cout)   # dy-major along K


def _basic_block_kernel(x_ref, t1_ref, t2_ref, bn_ref, sel_ref, out_ref,
                        *, n, h, w, c):
    """Fused conv1+bn1+relu -> conv2+bn2 -> +identity residual.

    x_ref   : (N*H, W*C)        input rows, lane-dense (channel fastest on lanes)
    t1/t2   : (3*W*C, W*C)      K-stacked banded conv weight operators
    bn_ref  : (4, C)            rows = [gamma1, beta1, gamma2, beta2]
    sel_ref : (C, W*C)          0/1 selector: channel -> lane broadcast
    out_ref : (N*H, W*C)
    """
    nh, wc = n * h, w * c
    inv_cnt = 1.0 / float(n * h * w)

    # Per-image H-boundary masks (also kill the roll wrap-around / cross-image
    # bleed): row h needs x[h-1] only if h % H != 0, x[h+1] only if h % H != H-1.
    rowmod = jax.lax.broadcasted_iota(jnp.int32, (nh, wc), 0) % h
    keep_up = rowmod != 0
    keep_dn = rowmod != (h - 1)

    def conv(xin, t_ref):
        # Height taps via aligned XLU rolls + VPU masks; one K = 3*W*C matmul.
        x_up = jnp.where(keep_up, pltpu.roll(xin, shift=1, axis=0), 0.0)
        x_dn = jnp.where(keep_dn, pltpu.roll(xin, shift=nh - 1, axis=0), 0.0)
        xs = jnp.concatenate([x_up, xin, x_dn], axis=1)          # (NH, 3*W*C)
        return jnp.dot(xs.astype(t_ref.dtype), t_ref[...],
                       preferred_element_type=jnp.float32)       # (NH, W*C)

    sel = sel_ref[...]                                           # (C, W*C)

    def batch_norm(acc, g, b):
        # One-pass per-channel stats, stacked into a single (2, W*C) x (W*C, C)
        # dot; scale/shift broadcast back to lanes with a single (2, C) x
        # (C, W*C) dot.  var = E[x^2] - E[x]^2, all in f32.
        stats = jnp.concatenate(
            [jnp.sum(acc, axis=0, keepdims=True),
             jnp.sum(acc * acc, axis=0, keepdims=True)], axis=0)   # (2, W*C)
        per_ch = jnp.dot(stats, sel.T,
                         preferred_element_type=jnp.float32) * inv_cnt  # (2, C)
        mean = per_ch[0:1]
        var = per_ch[1:2] - mean * mean
        scale = g * jax.lax.rsqrt(var + BN_EPS)                  # (1, C)
        shift = b - mean * scale                                 # (1, C)
        ss_l = jnp.dot(jnp.concatenate([scale, shift], axis=0), sel,
                       preferred_element_type=jnp.float32)       # (2, W*C)
        return acc * ss_l[0:1] + ss_l[1:2]

    g1, b1 = bn_ref[0:1, :], bn_ref[1:2, :]
    g2, b2 = bn_ref[2:3, :], bn_ref[3:4, :]

    # Stage 1: conv1 + bn1 + relu (result stays in vregs/VMEM).
    y1 = jnp.maximum(batch_norm(conv(x_ref[...], t1_ref), g1, b1), 0.0)

    # Stage 2: conv2 + bn2 + identity residual (x re-read from VMEM instead of
    # keeping it live across both stages).
    y2 = batch_norm(conv(y1, t2_ref), g2, b2) + x_ref[...].astype(jnp.float32)

    out_ref[...] = y2.astype(out_ref.dtype)


def _full_spec(shape):
    return pl.BlockSpec(shape, lambda i: (0,) * len(shape))


def basic_block_linear(x_nchw, w1_oihw, g1, b1, w2_oihw, g2, b2,
                       *, conv_operand_dtype=jnp.float32):
    """BasicBlockLinear forward (identity-shortcut config). x_nchw: (N, C, H, W).

    conv_operand_dtype=jnp.bfloat16 triples MXU throughput at MXU-bound shapes
    (accumulation stays f32); default f32 keeps the tight-tolerance self-test.
    """
    n, cin, hh, ww = x_nchw.shape
    cout = w1_oihw.shape[0]
    if cin != cout:
        # TODO(synk): projection shortcut (1x1 conv + BN) not implemented.
        raise NotImplementedError("only the identity-shortcut configuration is supported")
    assert w1_oihw.shape == (cout, cin, 3, 3) and w2_oihw.shape == (cout, cout, 3, 3)
    # Banded-Toeplitz operator is (W*Cin)^2 per tap; only sensible while small.
    assert ww * cin <= 512, "switch to im2col-along-width for larger feature maps"

    # NCHW -> NHWC -> lane-dense rows (N*H, W*C); channels fastest on lanes.
    x_rows = jnp.transpose(x_nchw, (0, 2, 3, 1)).reshape(n * hh, ww * cin)

    t1 = _stacked_conv_matrix(w1_oihw, ww).astype(conv_operand_dtype)
    t2 = _stacked_conv_matrix(w2_oihw, ww).astype(conv_operand_dtype)

    # All BN affine params packed into one (4, C) operand.
    bn_params = jnp.stack([
        jnp.asarray(g1, jnp.float32).reshape(-1),
        jnp.asarray(b1, jnp.float32).reshape(-1),
        jnp.asarray(g2, jnp.float32).reshape(-1),
        jnp.asarray(b2, jnp.float32).reshape(-1)], axis=0)        # (4, C)

    # 0/1 selector mapping channels <-> interleaved lanes (exact f32).
    lane_ch = jnp.arange(ww * cout) % cout
    sel = (jnp.arange(cout)[:, None] == lane_ch[None, :]).astype(jnp.float32)  # (C, W*C)

    kernel = functools.partial(_basic_block_kernel, n=n, h=hh, w=ww, c=cout)
    args = (x_rows, t1, t2, bn_params, sel)

    out_rows = pl.pallas_call(
        kernel,
        out_shape=jax.ShapeDtypeStruct((n * hh, ww * cout), x_nchw.dtype),
        grid=(1,),
        in_specs=[_full_spec(a.shape) for a in args],
        out_specs=_full_spec((n * hh, ww * cout)),
        compiler_params=pltpu.CompilerParams(
            dimension_semantics=("arbitrary",),
            vmem_limit_bytes=32 * 1024 * 1024),
    )(*args)

    return jnp.transpose(out_rows.reshape(n, hh, ww, cout), (0, 3, 1, 2))


def _ref_forward(x, w1_oihw, g1, b1, w2_oihw, g2, b2, *, precision):
    """Plain-JAX reference (NCHW), matching the PyTorch module in training mode."""
    def conv(t, w):
        return jax.lax.conv_general_dilated(
            t, w, window_strides=(1, 1), padding=((1, 1), (1, 1)),
            dimension_numbers=("NCHW", "OIHW", "NCHW"), precision=precision)

    def bn(t, g, b):
        mean = jnp.mean(t, axis=(0, 2, 3), keepdims=True)
        var = jnp.mean((t - mean) ** 2, axis=(0, 2, 3), keepdims=True)
        tn = (t - mean) * jax.lax.rsqrt(var + BN_EPS)
        return tn * g.reshape(1, -1, 1, 1) + b.reshape(1, -1, 1, 1)

    out = jax.nn.relu(bn(conv(x, w1_oihw), g1, b1))
    out = bn(conv(out, w2_oihw), g2, b2)
    return out + x


if __name__ == "__main__":
    key = jax.random.PRNGKey(0)
    kx, kw1, kw2, kg1, kb1, kg2, kb2 = jax.random.split(key, 7)

    N, in_planes, planes, H, W = 2, 8, 8, 16, 16  # stride=1 -> identity shortcut

    x = jax.random.normal(kx, (N, in_planes, H, W), jnp.float32)

    # Kaiming-like conv weights, PyTorch OIHW layout.
    w1 = jax.random.normal(kw1, (planes, in_planes, 3, 3), jnp.float32)
    w1 = w1 * (2.0 / (in_planes * 9)) ** 0.5
    w2 = jax.random.normal(kw2, (planes, planes, 3, 3), jnp.float32)
    w2 = w2 * (2.0 / (planes * 9)) ** 0.5

    # Non-trivial BN affine params to exercise the scale/shift path.
    g1 = 1.0 + 0.1 * jax.random.normal(kg1, (planes,), jnp.float32)
    b1 = 0.1 * jax.random.normal(kb1, (planes,), jnp.float32)
    g2 = 1.0 + 0.1 * jax.random.normal(kg2, (planes,), jnp.float32)
    b2 = 0.1 * jax.random.normal(kb2, (planes,), jnp.float32)

    out = jax.jit(basic_block_linear)(x, w1, g1, b1, w2, g2, b2)
    out = jax.block_until_ready(out)
    assert out.shape == (N, planes, H, W)

    # Tight self-test: compare against a HIGHEST-precision reference.  The
    # tolerance floor is 5e-4 and is widened only by the platform's measured
    # matmul-precision noise (gap between DEFAULT- and HIGHEST-precision refs).
    ref_hi = _ref_forward(x, w1, g1, b1, w2, g2, b2,
                          precision=jax.lax.Precision.HIGHEST)
    ref_lo = _ref_forward(x, w1, g1, b1, w2, g2, b2,
                          precision=jax.lax.Precision.DEFAULT)
    precision_gap = float(jnp.max(jnp.abs(ref_hi - ref_lo)))
    tol = max(5e-4, 10.0 * precision_gap)
    err = float(jnp.max(jnp.abs(out - ref_hi)))
    assert err < tol, f"kernel/ref mismatch: max abs err {err} (tol {tol})"

    print("KERNEL_OK")
</pallas_src>

<mosaic_0001>
module attributes {stable_mosaic.version = 11 : i64} {
  func.func @_basic_block_kernel(%arg0: i32, %arg1: memref<32x128xf32, #tpu.memory_space<vmem>>, %arg2: memref<384x128xf32, #tpu.memory_space<vmem>>, %arg3: memref<384x128xf32, #tpu.memory_space<vmem>>, %arg4: memref<4x8xf32, #tpu.memory_space<vmem>>, %arg5: memref<8x128xf32, #tpu.memory_space<vmem>>, %arg6: memref<32x128xf32, #tpu.memory_space<vmem>>) attributes {dimension_semantics = [#tpu.dimension_semantics<arbitrary>], iteration_bounds = array<i64: 1>, scalar_prefetch = 0 : i64, scratch_operands = 0 : i64, tpu.core_type = #tpu.core_type<tc>, window_params = [{pipeline_mode = #tpu.pipeline_mode<synchronous>, transform_indices = @transform_0, window_bounds = array<i64: 32, 128>}, {pipeline_mode = #tpu.pipeline_mode<synchronous>, transform_indices = @transform_1, window_bounds = array<i64: 384, 128>}, {pipeline_mode = #tpu.pipeline_mode<synchronous>, transform_indices = @transform_2, window_bounds = array<i64: 384, 128>}, {pipeline_mode = #tpu.pipeline_mode<synchronous>, transform_indices = @transform_3, window_bounds = array<i64: 4, 8>}, {pipeline_mode = #tpu.pipeline_mode<synchronous>, transform_indices = @transform_4, window_bounds = array<i64: 8, 128>}, {pipeline_mode = #tpu.pipeline_mode<synchronous>, transform_indices = @transform_5, window_bounds = array<i64: 32, 128>}]} {
    %0 = tpu.iota {dimensions = array<i32: 0>} : vector<32x128xi32>
    %c16_i32 = arith.constant 16 : i32
    %c0_i32 = arith.constant 0 : i32
    %1 = arith.cmpi eq, %c16_i32, %c0_i32 : i32
    %c1_i32 = arith.constant 1 : i32
    %2 = arith.select %1, %c1_i32, %c16_i32 : i32
    %3 = vector.broadcast %2 : i32 to vector<32x128xi32>
    %4 = arith.remsi %0, %3 : vector<32x128xi32>
    %c0_i32_0 = arith.constant 0 : i32
    %5 = vector.broadcast %c0_i32_0 : i32 to vector<32x128xi32>
    %6 = arith.cmpi ne, %4, %5 : vector<32x128xi32>
    %c0_i32_1 = arith.constant 0 : i32
    %7 = vector.broadcast %c0_i32_1 : i32 to vector<32x128xi32>
    %8 = arith.cmpi slt, %4, %7 : vector<32x128xi32>
    %c0_i32_2 = arith.constant 0 : i32
    %9 = arith.cmpi slt, %2, %c0_i32_2 : i32
    %10 = vector.broadcast %9 : i1 to vector<32x128xi1>
    %11 = vector.broadcast %10 : vector<32x128xi1> to vector<32x128xi1>
    %12 = arith.xori %8, %11 : vector<32x128xi1>
    %13 = arith.andi %12, %6 : vector<32x128xi1>
    %14 = vector.broadcast %2 : i32 to vector<32x128xi32>
    %15 = arith.addi %4, %14 : vector<32x128xi32>
    %16 = arith.select %13, %15, %4 : vector<32x128xi1>, vector<32x128xi32>
    %c0_i32_3 = arith.constant 0 : i32
    %17 = vector.broadcast %c0_i32_3 : i32 to vector<32x128xi32>
    %18 = arith.cmpi ne, %16, %17 : vector<32x128xi32>
    %c15_i32 = arith.constant 15 : i32
    %19 = vector.broadcast %c15_i32 : i32 to vector<32x128xi32>
    %20 = arith.cmpi ne, %16, %19 : vector<32x128xi32>
    %c0 = arith.constant 0 : index
    %c0_4 = arith.constant 0 : index
    %21 = vector.load %arg5[%c0, %c0_4] : memref<8x128xf32, #tpu.memory_space<vmem>>, vector<8x128xf32>
    %c0_5 = arith.constant 0 : index
    %c0_6 = arith.constant 0 : index
    %22 = vector.load %arg4[%c0_5, %c0_6] : memref<4x8xf32, #tpu.memory_space<vmem>>, vector<1x8xf32>
    %c1 = arith.constant 1 : index
    %c0_7 = arith.constant 0 : index
    %23 = vector.load %arg4[%c1, %c0_7] : memref<4x8xf32, #tpu.memory_space<vmem>>, vector<1x8xf32>
    %c2 = arith.constant 2 : index
    %c0_8 = arith.constant 0 : index
    %24 = vector.load %arg4[%c2, %c0_8] : memref<4x8xf32, #tpu.memory_space<vmem>>, vector<1x8xf32>
    %c3 = arith.constant 3 : index
    %c0_9 = arith.constant 0 : index
    %25 = vector.load %arg4[%c3, %c0_9] : memref<4x8xf32, #tpu.memory_space<vmem>>, vector<1x8xf32>
    %c0_10 = arith.constant 0 : index
    %c0_11 = arith.constant 0 : index
    %26 = vector.load %arg1[%c0_10, %c0_11] : memref<32x128xf32, #tpu.memory_space<vmem>>, vector<32x128xf32>
    %c1_i32_12 = arith.constant 1 : i32
    %27 = tpu.dynamic_rotate %26 by %c1_i32_12 dim 0 : vector<32x128xf32>, i32 -> vector<32x128xf32>
    %cst = arith.constant 0.000000e+00 : f32
    %28 = vector.broadcast %cst : f32 to vector<32x128xf32>
    %29 = arith.select %18, %27, %28 : vector<32x128xi1>, vector<32x128xf32>
    %c31_i32 = arith.constant 31 : i32
    %30 = tpu.dynamic_rotate %26 by %c31_i32 dim 0 : vector<32x128xf32>, i32 -> vector<32x128xf32>
    %cst_13 = arith.constant 0.000000e+00 : f32
    %31 = vector.broadcast %cst_13 : f32 to vector<32x128xf32>
    %32 = arith.select %20, %30, %31 : vector<32x128xi1>, vector<32x128xf32>
    %33 = tpu.concatenate %29, %26, %32 in 1 : vector<32x128xf32>, vector<32x128xf32>, vector<32x128xf32> -> vector<32x384xf32>
    %c0_14 = arith.constant 0 : index
    %c0_15 = arith.constant 0 : index
    %34 = vector.load %arg2[%c0_14, %c0_15] : memref<384x128xf32, #tpu.memory_space<vmem>>, vector<384x128xf32>
    %cst_16 = arith.constant dense<0.000000e+00> : vector<32x128xf32>
    %35 = tpu.matmul %33, %34, %cst_16 {dimension_numbers = #tpu.dot_dimension_numbers<[1], [0], [0], [1], [0, 0, 1, 1], [], []>} : vector<32x384xf32>, vector<384x128xf32>, vector<32x128xf32> -> vector<32x128xf32>
    %cst_17 = arith.constant dense<0.000000e+00> : vector<128xf32>
    %36 = vector.multi_reduction <add>, %35, %cst_17 [0] : vector<32x128xf32> to vector<128xf32>
    %37 = vector.shape_cast %36 : vector<128xf32> to vector<1x128xf32>
    %38 = arith.mulf %35, %35 : vector<32x128xf32>
    %cst_18 = arith.constant dense<0.000000e+00> : vector<128xf32>
    %39 = vector.multi_reduction <add>, %38, %cst_18 [0] : vector<32x128xf32> to vector<128xf32>
    %40 = vector.shape_cast %39 : vector<128xf32> to vector<1x128xf32>
    %41 = tpu.concatenate %37, %40 in 0 : vector<1x128xf32>, vector<1x128xf32> -> vector<2x128xf32>
    %42 = tpu.transpose %21, [1, 0] : vector<8x128xf32> -> vector<128x8xf32>
    %cst_19 = arith.constant dense<0.000000e+00> : vector<2x8xf32>
    %43 = tpu.matmul %41, %42, %cst_19 {dimension_numbers = #tpu.dot_dimension_numbers<[1], [0], [0], [1], [0, 0, 1, 1], [], []>} : vector<2x128xf32>, vector<128x8xf32>, vector<2x8xf32> -> vector<2x8xf32>
    %cst_20 = arith.constant 0.001953125 : f32
    %44 = vector.broadcast %cst_20 : f32 to vector<2x8xf32>
    %45 = arith.mulf %43, %44 : vector<2x8xf32>
    %46 = vector.extract_strided_slice %45 {offsets = [0, 0], sizes = [1, 8], strides = [1, 1]} : vector<2x8xf32> to vector<1x8xf32>
    %47 = vector.extract_strided_slice %45 {offsets = [1, 0], sizes = [1, 8], strides = [1, 1]} : vector<2x8xf32> to vector<1x8xf32>
    %48 = arith.mulf %46, %46 : vector<1x8xf32>
    %49 = arith.subf %47, %48 : vector<1x8xf32>
    %cst_21 = arith.constant 9.99999974E-6 : f32
    %50 = vector.broadcast %cst_21 : f32 to vector<1x8xf32>
    %51 = arith.addf %49, %50 : vector<1x8xf32>
    %52 = math.rsqrt %51 : vector<1x8xf32>
    %53 = arith.mulf %22, %52 : vector<1x8xf32>
    %54 = arith.mulf %46, %53 : vector<1x8xf32>
    %55 = arith.subf %23, %54 : vector<1x8xf32>
    %56 = tpu.concatenate %53, %55 in 0 : vector<1x8xf32>, vector<1x8xf32> -> vector<2x8xf32>
    %cst_22 = arith.constant dense<0.000000e+00> : vector<2x128xf32>
    %57 = tpu.matmul %56, %21, %cst_22 {dimension_numbers = #tpu.dot_dimension_numbers<[1], [0], [0], [1], [0, 0, 1, 1], [], []>} : vector<2x8xf32>, vector<8x128xf32>, vector<2x128xf32> -> vector<2x128xf32>
    %58 = vector.extract_strided_slice %57 {offsets = [0, 0], sizes = [1, 128], strides = [1, 1]} : vector<2x128xf32> to vector<1x128xf32>
    %59 = vector.broadcast %58 : vector<1x128xf32> to vector<32x128xf32>
    %60 = arith.mulf %35, %59 : vector<32x128xf32>
    %61 = vector.extract_strided_slice %57 {offsets = [1, 0], sizes = [1, 128], strides = [1, 1]} : vector<2x128xf32> to vector<1x128xf32>
    %62 = vector.broadcast %61 : vector<1x128xf32> to vector<32x128xf32>
    %63 = arith.addf %60, %62 : vector<32x128xf32>
    %cst_23 = arith.constant 0.000000e+00 : f32
    %64 = vector.broadcast %cst_23 : f32 to vector<32x128xf32>
    %65 = arith.maximumf %63, %64 : vector<32x128xf32>
    %c1_i32_24 = arith.constant 1 : i32
    %66 = tpu.dynamic_rotate %65 by %c1_i32_24 dim 0 : vector<32x128xf32>, i32 -> vector<32x128xf32>
    %cst_25 = arith.constant 0.000000e+00 : f32
    %67 = vector.broadcast %cst_25 : f32 to vector<32x128xf32>
    %68 = arith.select %18, %66, %67 : vector<32x128xi1>, vector<32x128xf32>
    %c31_i32_26 = arith.constant 31 : i32
    %69 = tpu.dynamic_rotate %65 by %c31_i32_26 dim 0 : vector<32x128xf32>, i32 -> vector<32x128xf32>
    %cst_27 = arith.constant 0.000000e+00 : f32
    %70 = vector.broadcast %cst_27 : f32 to vector<32x128xf32>
    %71 = arith.select %20, %69, %70 : vector<32x128xi1>, vector<32x128xf32>
    %72 = tpu.concatenate %68, %65, %71 in 1 : vector<32x128xf32>, vector<32x128xf32>, vector<32x128xf32> -> vector<32x384xf32>
    %c0_28 = arith.constant 0 : index
    %c0_29 = arith.constant 0 : index
    %73 = vector.load %arg3[%c0_28, %c0_29] : memref<384x128xf32, #tpu.memory_space<vmem>>, vector<384x128xf32>
    %cst_30 = arith.constant dense<0.000000e+00> : vector<32x128xf32>
    %74 = tpu.matmul %72, %73, %cst_30 {dimension_numbers = #tpu.dot_dimension_numbers<[1], [0], [0], [1], [0, 0, 1, 1], [], []>} : vector<32x384xf32>, vector<384x128xf32>, vector<32x128xf32> -> vector<32x128xf32>
    %cst_31 = arith.constant dense<0.000000e+00> : vector<128xf32>
    %75 = vector.multi_reduction <add>, %74, %cst_31 [0] : vector<32x128xf32> to vector<128xf32>
    %76 = vector.shape_cast %75 : vector<128xf32> to vector<1x128xf32>
    %77 = arith.mulf %74, %74 : vector<32x128xf32>
    %cst_32 = arith.constant dense<0.000000e+00> : vector<128xf32>
    %78 = vector.multi_reduction <add>, %77, %cst_32 [0] : vector<32x128xf32> to vector<128xf32>
    %79 = vector.shape_cast %78 : vector<128xf32> to vector<1x128xf32>
    %80 = tpu.concatenate %76, %79 in 0 : vector<1x128xf32>, vector<1x128xf32> -> vector<2x128xf32>
    %81 = tpu.transpose %21, [1, 0] : vector<8x128xf32> -> vector<128x8xf32>
    %cst_33 = arith.constant dense<0.000000e+00> : vector<2x8xf32>
    %82 = tpu.matmul %80, %81, %cst_33 {dimension_numbers = #tpu.dot_dimension_numbers<[1], [0], [0], [1], [0, 0, 1, 1], [], []>} : vector<2x128xf32>, vector<128x8xf32>, vector<2x8xf32> -> vector<2x8xf32>
    %cst_34 = arith.constant 0.001953125 : f32
    %83 = vector.broadcast %cst_34 : f32 to vector<2x8xf32>
    %84 = arith.mulf %82, %83 : vector<2x8xf32>
    %85 = vector.extract_strided_slice %84 {offsets = [0, 0], sizes = [1, 8], strides = [1, 1]} : vector<2x8xf32> to vector<1x8xf32>
    %86 = vector.extract_strided_slice %84 {offsets = [1, 0], sizes = [1, 8], strides = [1, 1]} : vector<2x8xf32> to vector<1x8xf32>
    %87 = arith.mulf %85, %85 : vector<1x8xf32>
    %88 = arith.subf %86, %87 : vector<1x8xf32>
    %cst_35 = arith.constant 9.99999974E-6 : f32
    %89 = vector.broadcast %cst_35 : f32 to vector<1x8xf32>
    %90 = arith.addf %88, %89 : vector<1x8xf32>
    %91 = math.rsqrt %90 : vector<1x8xf32>
    %92 = arith.mulf %24, %91 : vector<1x8xf32>
    %93 = arith.mulf %85, %92 : vector<1x8xf32>
    %94 = arith.subf %25, %93 : vector<1x8xf32>
    %95 = tpu.concatenate %92, %94 in 0 : vector<1x8xf32>, vector<1x8xf32> -> vector<2x8xf32>
    %cst_36 = arith.constant dense<0.000000e+00> : vector<2x128xf32>
    %96 = tpu.matmul %95, %21, %cst_36 {dimension_numbers = #tpu.dot_dimension_numbers<[1], [0], [0], [1], [0, 0, 1, 1], [], []>} : vector<2x8xf32>, vector<8x128xf32>, vector<2x128xf32> -> vector<2x128xf32>
    %97 = vector.extract_strided_slice %96 {offsets = [0, 0], sizes = [1, 128], strides = [1, 1]} : vector<2x128xf32> to vector<1x128xf32>
    %98 = vector.broadcast %97 : vector<1x128xf32> to vector<32x128xf32>
    %99 = arith.mulf %74, %98 : vector<32x128xf32>
    %100 = vector.extract_strided_slice %96 {offsets = [1, 0], sizes = [1, 128], strides = [1, 1]} : vector<2x128xf32> to vector<1x128xf32>
    %101 = vector.broadcast %100 : vector<1x128xf32> to vector<32x128xf32>
    %102 = arith.addf %99, %101 : vector<32x128xf32>
    %c0_37 = arith.constant 0 : index
    %c0_38 = arith.constant 0 : index
    %103 = vector.load %arg1[%c0_37, %c0_38] : memref<32x128xf32, #tpu.memory_space<vmem>>, vector<32x128xf32>
    %104 = arith.addf %102, %103 : vector<32x128xf32>
    %c0_39 = arith.constant 0 : index
    %c0_40 = arith.constant 0 : index
    %105 = vector.load %arg6[%c0_39, %c0_40] : memref<32x128xf32, #tpu.memory_space<vmem>>, vector<32x128xf32>
    tpu.vector_store %arg6[%c0_39, %c0_40], %104 {strides = array<i32>} : memref<32x128xf32, #tpu.memory_space<vmem>>, vector<32x128xf32>,
    return
  }
  func.func @transform_0(%arg0: i32) -> (i32, i32) {
    %c0_i32 = arith.constant 0 : i32
    %c0_i32_0 = arith.constant 0 : i32
    %c0_i32_1 = arith.constant 0 : i32
    return %c0_i32, %c0_i32_0 : i32, i32
  }
  func.func @transform_1(%arg0: i32) -> (i32, i32) {
    %c0_i32 = arith.constant 0 : i32
    %c0_i32_0 = arith.constant 0 : i32
    %c0_i32_1 = arith.constant 0 : i32
    return %c0_i32, %c0_i32_0 : i32, i32
  }
  func.func @transform_2(%arg0: i32) -> (i32, i32) {
    %c0_i32 = arith.constant 0 : i32
    %c0_i32_0 = arith.constant 0 : i32
    %c0_i32_1 = arith.constant 0 : i32
    return %c0_i32, %c0_i32_0 : i32, i32
  }
  func.func @transform_3(%arg0: i32) -> (i32, i32) {
    %c0_i32 = arith.constant 0 : i32
    %c0_i32_0 = arith.constant 0 : i32
    %c0_i32_1 = arith.constant 0 : i32
    return %c0_i32, %c0_i32_0 : i32, i32
  }
  func.func @transform_4(%arg0: i32) -> (i32, i32) {
    %c0_i32 = arith.constant 0 : i32
    %c0_i32_0 = arith.constant 0 : i32
    %c0_i32_1 = arith.constant 0 : i32
    return %c0_i32, %c0_i32_0 : i32, i32
  }
  func.func @transform_5(%arg0: i32) -> (i32, i32) {
    %c0_i32 = arith.constant 0 : i32
    %c0_i32_0 = arith.constant 0 : i32
    %c0_i32_1 = arith.constant 0 : i32
    return %c0_i32, %c0_i32_0 : i32, i32
  }
}

</mosaic_0001>

<bundles_post_ra>
// kernel: basic_block_linear.1
= control target key start
LH: loop header
LB: loop body
LE: loop exit
PB: predicated region body
PF: predicated region fallthrough
CT: control target
= control target key end

     0   :  { %v20_v39 = vlaneseq  ;;  %vm1371_vm6 = vmmov 0   ;;  %vm356_vm7 = vcmask 1040384   ;;  %vm446_vm8 = vcmask 64512   ;;  %s1893_s1 = inlined_call_operand.vmem [shape: f32[384,128], index: 1, kind: input, shape index: {}]   ;;  %s1894_s0 = inlined_call_operand.vmem [shape: f32[32,128], index: 0, kind: input, shape index: {}]   ;;  %s1895_s4 = inlined_call_operand.vmem [shape: f32[8,128], index: 4, kind: input, shape index: {}]   ;;  %s1896_s2 = inlined_call_operand.vmem [shape: f32[384,128], index: 2, kind: input, shape index: {}]   ;;  %s1897_s3 = inlined_call_operand.vmem [shape: f32[4,8], index: 3, kind: input, shape index: {}]   ;;  %s1898_s5 = inlined_call_operand.vmem [shape: f32[32,128], index: 5, kind: output, shape index: {}]  }
   0x1   :  { %v132_v0 = vld [vmem:[%s1893_s1 + $0x80] sm:$0xff]  ;;  %v133_v1 = vld [vmem:[%s1893_s1 + $0x88] sm:$0xff]  ;;  %v134_v9 = vld [vmem:[%s1893_s1 + $0x90] sm:$0xff] }
   0x2   :  { %v116_v2 = vld [vmem:[%s1893_s1] sm:$0xff]  ;;  %v1236_v3 = vpack.c.bf16 %v133_v1, %v132_v0  ;;  %v117_v4 = vld [vmem:[%s1893_s1 + $0x8] sm:$0xff]  ;;  %v135_v10 = vld [vmem:[%s1893_s1 + $0x98] sm:$0xff]  ;;  %v1504_v49 = vshrl.u32 %v20_v39, 7 }
   0x3   :  { %v148_v5 = vld [vmem:[%s1893_s1 + $0x100] sm:$0xff]  ;;  %v149_v6 = vld [vmem:[%s1893_s1 + $0x108] sm:$0xff]  ;;  %v1238_v7 = vpack.c.bf16 %v117_v4, %v116_v2  ;;  %v118_v11 = vld [vmem:[%s1893_s1 + $0x10] sm:$0xff]  ;;  %v1240_v12 = vpack.c.bf16 %v135_v10, %v134_v9 }
   0x4   :  { %v1268_v8 = vpack.c.bf16 %v149_v6, %v148_v5  ;;  %1237 = vmatprep.subr.bf16.mxu0 %v1236_v3  ;;  %v119_v13 = vld [vmem:[%s1893_s1 + $0x18] sm:$0xff]  ;;  %v150_v14 = vld [vmem:[%s1893_s1 + $0x110] sm:$0xff]  ;;  %v136_v18 = vld [vmem:[%s1893_s1 + $0xa0] sm:$0xff]  ;;  %vm107_vm0 = vcmp.lt.s32.totalorder %v1504_v49, 7  ;;  %vm94_vm1 = vcmp.lt.s32.totalorder %v1504_v49, 1 }
   0x5   :  { %v151_v15 = vld [vmem:[%s1893_s1 + $0x118] sm:$0xff]  ;;  %1239 = vmatpush3.bf16.msra.mxu0 %v1238_v7  ;;  %v1242_v16 = vpack.c.bf16 %v119_v13, %v118_v11  ;;  %v137_v19 = vld [vmem:[%s1893_s1 + $0xa8] sm:$0xff]  ;;  %v120_v20 = vld [vmem:[%s1893_s1 + $0x20] sm:$0xff] }
   0x6   :  { %1269 = vmatprep.subr.bf16.mxu1 %v1268_v8  ;;  %v1272_v17 = vpack.c.bf16 %v151_v15, %v150_v14  ;;  %1241 = vmatprep.subr.bf16.mxu0 %v1240_v12  ;;  %v1244_v21 = vpack.c.bf16 %v137_v19, %v136_v18  ;;  %v121_v22 = vld [vmem:[%s1893_s1 + $0x28] sm:$0xff]  ;;  %v152_v23 = vld [vmem:[%s1893_s1 + $0x120] sm:$0xff]  ;;  %v138_v26 = vld [vmem:[%s1893_s1 + $0xb0] sm:$0xff]  ;;  %v22_v14 = vadd.s32 8, %v1504_v49  ;;  %v29_v19 = vand.u32 15, %v1504_v49 }
   0x7   :  { %1271 = vmatpush3.bf16.msra.mxu1 %v1268_v8  ;;  %v153_v24 = vld [vmem:[%s1893_s1 + $0x128] sm:$0xff]  ;;  %v139_v27 = vld [vmem:[%s1893_s1 + $0xb8] sm:$0xff]  ;;  %v154_v28 = vld [vmem:[%s1893_s1 + $0x130] sm:$0xff]  ;;  %v1246_v30 = vpack.c.bf16 %v121_v22, %v120_v20 }
   0x8   :  { %1273 = vmatprep.subr.bf16.mxu1 %v1272_v17  ;;  %v1276_v25 = vpack.c.bf16 %v153_v24, %v152_v23  ;;  %v155_v29 = vld [vmem:[%s1893_s1 + $0x138] sm:$0xff]  ;;  %v1248_v31 = vpack.c.bf16 %v139_v27, %v138_v26  ;;  %v122_v32 = vld [vmem:[%s1893_s1 + $0x30] sm:$0xff]  ;;  %v140_v35 = vld [vmem:[%s1893_s1 + $0xc0] sm:$0xff]  ;;  %v24_v23 = vadd.s32 24, %v1504_v49  ;;  %vm1584_vm2 = vcmp.ne.s32.totalorder %v29_v19, 0 }
   0x9   :  { %1243 = vmatpush3.bf16.msra.mxu0 %v1242_v16  ;;  %v123_v33 = vld [vmem:[%s1893_s1 + $0x38] sm:$0xff]  ;;  %v1280_v34 = vpack.c.bf16 %v155_v29, %v154_v28  ;;  %v141_v36 = vld [vmem:[%s1893_s1 + $0xc8] sm:$0xff]  ;;  %v156_v37 = vld [vmem:[%s1893_s1 + $0x140] sm:$0xff]  ;;  %v23_v28 = vadd.s32 16, %v1504_v49 }
   0xa   :  { %1245 = vmatprep.subr.bf16.mxu0 %v1244_v21  ;;  %v157_v38 = vld [vmem:[%s1893_s1 + $0x148] sm:$0xff]  ;;  %v1250_v40 = vpack.c.bf16 %v123_v33, %v122_v32  ;;  %v1252_v41 = vpack.c.bf16 %v141_v36, %v140_v35  ;;  %v124_v42 = vld [vmem:[%s1893_s1 + $0x40] sm:$0xff]  ;;  %v142_v45 = vld [vmem:[%s1893_s1 + $0xd0] sm:$0xff]  ;;  %v36_v21 = vand.u32 15, %v22_v14 }
   0xb   :  { %1275 = vmatpush3.bf16.msra.mxu1 %v1272_v17  ;;  %v125_v43 = vld [vmem:[%s1893_s1 + $0x48] sm:$0xff]  ;;  %v1284_v44 = vpack.c.bf16 %v157_v38, %v156_v37  ;;  %v143_v46 = vld [vmem:[%s1893_s1 + $0xd8] sm:$0xff]  ;;  %v158_v47 = vld [vmem:[%s1893_s1 + $0x150] sm:$0xff] }
   0xc   :  { %1277 = vmatprep.subr.bf16.mxu1 %v1276_v25  ;;  %v159_v48 = vld [vmem:[%s1893_s1 + $0x158] sm:$0xff]  ;;  %v1254_v50 = vpack.c.bf16 %v125_v43, %v124_v42  ;;  %v1509_v51 = vld [vmem:[%s1894_s0] sm:$0xff]  ;;  %v1256_v52 = vpack.c.bf16 %v143_v46, %v142_v45  ;;  %v126_v53 = vld [vmem:[%s1893_s1 + $0x50] sm:$0xff]  ;;  %vm1592_vm3 = vcmp.ne.s32.totalorder %v36_v21, 15 }
   0xd   :  { %1247 = vmatpush3.bf16.msra.mxu0 %v1246_v30  ;;  %v127_v54 = vld [vmem:[%s1893_s1 + $0x58] sm:$0xff]  ;;  %v1520_v55 = vld [vmem:[%s1894_s0 + $0x8] sm:$0xff]  ;;  %v103_v56 = vrot.slane %v1509_v51, 1  ;;  %v1288_v57 = vpack.c.bf16 %v159_v48, %v158_v47  ;;  %v144_v58 = vld [vmem:[%s1893_s1 + $0xe0] sm:$0xff]  ;;  %228 = vmatprep.mubr.f32.mxu0 %v1509_v51  ;;  %v90_v18 = vrot.slane %v1509_v51, 7 }
   0xe   :  { %1249 = vmatprep.subr.bf16.mxu0 %v1248_v31  ;;  %v145_v59 = vld [vmem:[%s1893_s1 + $0xe8] sm:$0xff]  ;;  %v104_v60 = vrot.slane %v1520_v55, 1  ;;  %v160_v61 = vld [vmem:[%s1893_s1 + $0x160] sm:$0xff]  ;;  %v1258_v63 = vpack.c.bf16 %v127_v54, %v126_v53  ;;  %v146_v5 = vld [vmem:[%s1893_s1 + $0xf0] sm:$0xff]  ;;  %v91_v27 = vrot.slane %v1520_v55, 7  ;;  %v50_v31 = vand.u32 15, %v24_v23 }
   0xf   :  { %1279 = vmatpush3.bf16.msra.mxu1 %v1276_v25  ;;  %v161_v62 = vld [vmem:[%s1893_s1 + $0x168] sm:$0xff]  ;;  %v1260_v1 = vpack.c.bf16 %v145_v59, %v144_v58  ;;  %v128_v2 = vld [vmem:[%s1893_s1 + $0x60] sm:$0xff]  ;;  %v147_v6 = vld [vmem:[%s1893_s1 + $0xf8] sm:$0xff] }
  0x10   :  { %1281 = vmatprep.subr.bf16.mxu1 %v1280_v34  ;;  %v110_v0 = vsel %vm107_vm0, %v103_v56, %v104_v60  ;;  %v129_v3 = vld [vmem:[%s1893_s1 + $0x68] sm:$0xff]  ;;  %v1292_v4 = vpack.c.bf16 %v161_v62, %v160_v61  ;;  %v162_v7 = vld [vmem:[%s1893_s1 + $0x170] sm:$0xff]  ;;  %v163_v8 = vld [vmem:[%s1893_s1 + $0x178] sm:$0xff]  ;;  %v1264_v10 = vpack.c.bf16 %v147_v6, %v146_v5  ;;  %v97_v33 = vsel %vm94_vm1, %v90_v18, %v91_v27 }
  0x11   :  { %1251 = vmatpush3.bf16.msra.mxu0 %v1250_v40  ;;  %1172 = vmatprep.mubr.f32.mxu1 %v110_v0  ;;  %v1262_v9 = vpack.c.bf16 %v129_v3, %v128_v2  ;;  %v130_v11 = vld [vmem:[%s1893_s1 + $0x70] sm:$0xff]  ;;  %v131_v12 = vld [vmem:[%s1893_s1 + $0x78] sm:$0xff]  ;;  %v1296_v15 = vpack.c.bf16 %v163_v8, %v162_v7  ;;  %vm1608_vm4 = vcmp.ne.s32.totalorder %v50_v31, 15  ;;  %v1634_v42 = vld [vmem:[%s1895_s4] sm:$0xff] }
  0x12   :  { %1253 = vmatprep.subr.bf16.mxu0 %v1252_v41  ;;  %v1569_v13 = vld [vmem:[%s1894_s0 + $0x18] sm:$0xff]  ;;  %v1575_v16 = vld [vmem:[%s1894_s0 + $0x10] sm:$0xff]  ;;  %v1266_v17 = vpack.c.bf16 %v131_v12, %v130_v11  ;;  %v1370_v41 = vmov 0.0   ;;  %v564_v31 = vld [vmem:[%s1896_s2] sm:$0xff] }
  0x13   :  { %1283 = vmatpush3.bf16.msra.mxu1 %v1280_v34  ;;  %v93_v20 = vrot.slane %v1569_v13, 7  ;;  %v105_v22 = vrot.slane %v1575_v16, 1  ;;  %v106_v24 = vrot.slane %v1569_v13, 1  ;;  %v43_v34 = vand.u32 15, %v23_v28  ;;  %v580_v28 = vld [vmem:[%s1896_s2 + $0x80] sm:$0xff] }
  0x14   :  { %1285 = vmatprep.subr.bf16.mxu1 %v1284_v44  ;;  %v92_v35 = vrot.slane %v1575_v16, 7 }
  0x15   :  { %1255 = vmatpush3.bf16.msra.mxu0 %v1254_v50  ;;  %v98_v26 = vsel %vm94_vm1, %v93_v20, %v90_v18  ;;  %v109_v30 = vsel %vm107_vm0, %v104_v60, %v105_v22  ;;  %v108_v32 = vsel %vm107_vm0, %v105_v22, %v106_v24  ;;  %v111_v37 = vsel %vm107_vm0, %v106_v24, %v103_v56 }
  0x16   :  { %1257 = vmatprep.subr.bf16.mxu0 %v1256_v52  ;;  %vm1617_vm5 = vcmp.ne.s32.totalorder %v43_v34, 0  ;;  %v96_v39 = vsel %vm94_vm1, %v91_v27, %v92_v35  ;;  %v95_v40 = vsel %vm94_vm1, %v92_v35, %v93_v20  ;;  %v596_v34 = vld [vmem:[%s1896_s2 + $0x100] sm:$0xff]  ;;  %v597_v35 = vld [vmem:[%s1896_s2 + $0x108] sm:$0xff] }
  0x17   :  { %1287 = vmatpush3.bf16.msra.mxu1 %v1284_v44 }
  0x18   :  { %1289 = vmatprep.subr.bf16.mxu1 %v1288_v57 }
  0x19   :  { %1259 = vmatpush3.bf16.msra.mxu0 %v1258_v63 }
  0x1a   :  { %1261 = vmatprep.subr.bf16.mxu0 %v1260_v1 }
  0x1b   :  { %1291 = vmatpush3.bf16.msra.mxu1 %v1288_v57 }
  0x1c   :  { %1293 = vmatprep.subr.bf16.mxu1 %v1292_v4 }
  0x1d   :  { %1263 = vmatpush3.bf16.msra.mxu0 %v1262_v9 }
  0x1e   :  { %1265 = vmatprep.subr.bf16.mxu0 %v1264_v10 }
  0x1f   :  { %1295 = vmatpush3.bf16.msra.mxu1 %v1292_v4 }
  0x20   :  { %1297 = vmatprep.subr.bf16.mxu1 %v1296_v15 }
  0x21   :  { %1267 = vmatpush3.bf16.msra.mxu0 %v1266_v17 }
  0x23   :  { %1299 = vmatpush3.bf16.msra.mxu1 %v1296_v15 }
  0x24   :  { %994 = vmatmul.mubr.msk.f32.vlgmr.msra.gmra.mrb[0].mxu0 %vm1584_vm2, %v98_v26  ;;  %1178 = vmatprep.subr.mxu1 %v1370_v41 }
  0x25   :  { %233 = vmatprep.mubr.f32.mxu0 %v1520_v55 }
  0x26   :  { %1173 = vmatmul.mubr.msk.f32.vlgmr.msra.gmra.mrb[0].mxu1 %vm1592_vm3, %v109_v30  ;;  %v581_v30 = vld [vmem:[%s1896_s2 + $0x88] sm:$0xff] }
  0x27   :  { %1175 = vmatprep.mubr.f32.mxu1 %v108_v32  ;;  %v1300_v32 = vpack.c.bf16 %v581_v30, %v580_v28 }
  0x28   :  { %234 = vmatmul.mubr.f32.gmra.mrb[2].mxu0 %v97_v33  ;;  %v565_v33 = vld [vmem:[%s1896_s2 + $0x8] sm:$0xff] }
  0x29   :  { %238 = vmatprep.mubr.f32.mxu0 %v1575_v16  ;;  %1301 = vmatprep.subr.bf16.mxu0 %v1300_v32  ;;  %v600_v32 = vld [vmem:[%s1896_s2 + $0x120] sm:$0xff] }
  0x2a   :  { %1176 = vmatmul.mubr.msk.f32.gmra.mrb[2].mxu1 %vm1608_vm4, %v111_v37  ;;  %v1302_v37 = vpack.c.bf16 %v565_v33, %v564_v31  ;;  %v601_v33 = vld [vmem:[%s1896_s2 + $0x128] sm:$0xff] }
  0x2b   :  { %1180 = vmatprep.mubr.msk.f32.mxu1 %vm1371_vm6, %v1370_v41 }
  0x2c   :  { %995 = vmatmul.mubr.msk.f32.gmra.mrb[4].mxu0 %vm1617_vm5, %v96_v39  ;;  %1179 = vmatpush3.xpose.msra.mxu1 %v1634_v42  ;;  %v1332_v39 = vpack.c.bf16 %v597_v35, %v596_v34  ;;  %v1340_v34 = vpack.c.bf16 %v601_v33, %v600_v32  ;;  %v602_v35 = vld [vmem:[%s1896_s2 + $0x130] sm:$0xff] }
  0x2d   :  { %243 = vmatprep.mubr.f32.mxu0 %v1569_v13  ;;  %1183 = vmatprep.subr.mxu1 %v1370_v41 }
  0x2e   :  { %1303 = vmatpush3.bf16.msra.mxu0 %v1302_v37  ;;  %v603_v37 = vld [vmem:[%s1896_s2 + $0x138] sm:$0xff] }
  0x30   :  { %244 = vmatmul.mubr.f32.gmra.mrb[6].mxu0 %v95_v40  ;;  %v582_v40 = vld [vmem:[%s1896_s2 + $0x90] sm:$0xff] }
  0xf7   :  { %v1036_v43 = vpop.f32.mrb[0].mxu0 }
  0xf8   :  { %v1037_v44 = vpop.f32.mrb[1].mxu0 }
  0xf9   :  { %v1174_v45 = vpop.f32.mrb[0].mxu1  ;;  %v1038_v46 = vadd.f32 %v1037_v44, %v1036_v43  ;;  %v583_v43 = vld [vmem:[%s1896_s2 + $0x98] sm:$0xff]  ;;  %v566_v44 = vld [vmem:[%s1896_s2 + $0x10] sm:$0xff] }
  0xfa   :  { %v315_v47 = vpop.f32.mrb[1].mxu1 }
  0xfb   :  { %v1640_v48 = vadd.f32 %v1038_v46, %v315_v47  ;;  %v1039_v50 = vpop.f32.mrb[2].mxu0  ;;  %v567_v46 = vld [vmem:[%s1896_s2 + $0x18] sm:$0xff] }
  0xfc   :  { %v1040_v52 = vpop.f32.mrb[3].mxu0  ;;  %v1306_v47 = vpack.c.bf16 %v567_v46, %v566_v44  ;;  %v591_v46 = vld [vmem:[%s1896_s2 + $0xd8] sm:$0xff] }
  0xfd   :  { %v1177_v53 = vpop.f32.mrb[2].mxu1  ;;  %v1041_v54 = vadd.f32 %v1040_v52, %v1039_v50  ;;  %v343_v1 = vmul.f32 %v1640_v48, %v1640_v48  ;;  %v584_v50 = vld [vmem:[%s1896_s2 + $0xa0] sm:$0xff]  ;;  %v585_v52 = vld [vmem:[%s1896_s2 + $0xa8] sm:$0xff] }
  0xfe   :  { %v325_v56 = vpop.f32.mrb[3].mxu1 }
  0xff   :  { %v1642_v57 = vadd.f32 %v1174_v45, %v1041_v54  ;;  %v1042_v58 = vpop.f32.mrb[4].mxu0  ;;  %v1304_v45 = vpack.c.bf16 %v583_v43, %v582_v40  ;;  %v568_v54 = vld [vmem:[%s1896_s2 + $0x20] sm:$0xff]  ;;  %v1344_v40 = vpack.c.bf16 %v603_v37, %v602_v35 }
 0x100   :  { %v1043_v59 = vpop.f32.mrb[5].mxu0  ;;  %v604_v43 = vld [vmem:[%s1896_s2 + $0x140] sm:$0xff] }
 0x101   :  { %v1044_v60 = vadd.f32 %v1043_v59, %v1042_v58  ;;  %v344_v61 = vmul.f32 %v1642_v57, %v1642_v57  ;;  %v334_v2 = vadd.f32 %v1642_v57, %v1640_v48  ;;  %1305 = vmatprep.subr.bf16.mxu0 %v1304_v45  ;;  %v586_v59 = vld [vmem:[%s1896_s2 + $0xb0] sm:$0xff] }
 0x102   :  { %1307 = vmatpush3.bf16.msra.mxu0 %v1306_v47  ;;  %v590_v45 = vld [vmem:[%s1896_s2 + $0xd0] sm:$0xff] }
 0x103   :  { %v1646_v62 = vadd.f32 %v1044_v60, %v325_v56  ;;  %v1045_v63 = vpop.f32.mrb[6].mxu0  ;;  %v347_v6 = vadd.f32 %v344_v61, %v343_v1  ;;  %v569_v56 = vld [vmem:[%s1896_s2 + $0x28] sm:$0xff]  ;;  %v587_v60 = vld [vmem:[%s1896_s2 + $0xb8] sm:$0xff]  ;;  %v1320_v47 = vpack.c.bf16 %v591_v46, %v590_v45 }
 0x104   :  { %v1046_v0 = vpop.f32.mrb[7].mxu0  ;;  %v1310_v58 = vpack.c.bf16 %v569_v56, %v568_v54  ;;  %v1312_v61 = vpack.c.bf16 %v587_v60, %v586_v59  ;;  %v607_v56 = vld [vmem:[%s1896_s2 + $0x158] sm:$0xff]  ;;  %v592_v59 = vld [vmem:[%s1896_s2 + $0xe0] sm:$0xff]  ;;  %v593_v60 = vld [vmem:[%s1896_s2 + $0xe8] sm:$0xff] }
 0x105   :  { %v345_v3 = vmul.f32 %v1646_v62, %v1646_v62  ;;  %v1047_v4 = vadd.f32 %v1046_v0, %v1045_v63  ;;  %v335_v5 = vadd.f32 %v334_v2, %v1646_v62  ;;  %v570_v63 = vld [vmem:[%s1896_s2 + $0x30] sm:$0xff]  ;;  %v571_v0 = vld [vmem:[%s1896_s2 + $0x38] sm:$0xff]  ;;  %v588_v2 = vld [vmem:[%s1896_s2 + $0xc0] sm:$0xff] }
 0x106   :  { %v1314_v1 = vpack.c.bf16 %v571_v0, %v570_v63  ;;  %v576_v63 = vld [vmem:[%s1896_s2 + $0x60] sm:$0xff]  ;;  %v577_v0 = vld [vmem:[%s1896_s2 + $0x68] sm:$0xff] }
 0x107   :  { %v1655_v7 = vadd.f32 %v1177_v53, %v1047_v4  ;;  %v348_v8 = vadd.f32 %v347_v6, %v345_v3  ;;  %v1308_v53 = vpack.c.bf16 %v585_v52, %v584_v50  ;;  %v589_v3 = vld [vmem:[%s1896_s2 + $0xc8] sm:$0xff]  ;;  %v574_v50 = vld [vmem:[%s1896_s2 + $0x50] sm:$0xff]  ;;  %v575_v52 = vld [vmem:[%s1896_s2 + $0x58] sm:$0xff] }
 0x108   :  { %v1316_v4 = vpack.c.bf16 %v589_v3, %v588_v2  ;;  %v573_v6 = vld [vmem:[%s1896_s2 + $0x48] sm:$0xff]  ;;  %v1322_v54 = vpack.c.bf16 %v575_v52, %v574_v50  ;;  %v1326_v2 = vpack.c.bf16 %v577_v0, %v576_v63 }
 0x109   :  { %v336_v9 = vadd.f32 %v335_v5, %v1655_v7  ;;  %v346_v10 = vmul.f32 %v1655_v7, %v1655_v7  ;;  %1309 = vmatprep.subr.bf16.mxu0 %v1308_v53  ;;  %v572_v5 = vld [vmem:[%s1896_s2 + $0x40] sm:$0xff]  ;;  %v606_v53 = vld [vmem:[%s1896_s2 + $0x150] sm:$0xff]  ;;  %v609_v3 = vld [vmem:[%s1896_s2 + $0x168] sm:$0xff] }
 0x10a   :  { %1311 = vmatpush3.bf16.msra.mxu0 %v1310_v58  ;;  %v1352_v58 = vpack.c.bf16 %v607_v56, %v606_v53 }
 0x10b   :  { %v337_v11 = vrot.slane %v336_v9, 4  ;;  %v349_v12 = vadd.f32 %v348_v8, %v346_v10  ;;  %1313 = vmatprep.subr.bf16.mxu0 %v1312_v61  ;;  %v1318_v8 = vpack.c.bf16 %v573_v6, %v572_v5  ;;  %v1324_v61 = vpack.c.bf16 %v593_v60, %v592_v59  ;;  %v594_v5 = vld [vmem:[%s1896_s2 + $0xf0] sm:$0xff]  ;;  %v595_v6 = vld [vmem:[%s1896_s2 + $0xf8] sm:$0xff] }
 0x10d   :  { %v338_v14 = vadd.f32 %v337_v11, %v336_v9  ;;  %v350_v15 = vrot.slane %v349_v12, 4 }
 0x10e   :  { %1315 = vmatpush3.bf16.msra.mxu0 %v1314_v1  ;;  %v608_v1 = vld [vmem:[%s1896_s2 + $0x160] sm:$0xff] }
 0x10f   :  { %v339_v17 = vrot.slane %v338_v14, 2  ;;  %v351_v18 = vadd.f32 %v350_v15, %v349_v12  ;;  %1317 = vmatprep.subr.bf16.mxu0 %v1316_v4  ;;  %v1356_v4 = vpack.c.bf16 %v609_v3, %v608_v1 }
 0x111   :  { %v340_v19 = vadd.f32 %v339_v17, %v338_v14  ;;  %v352_v20 = vrot.slane %v351_v18, 2 }
 0x112   :  { %1319 = vmatpush3.bf16.msra.mxu0 %v1318_v8  ;;  %v1328_v8 = vpack.c.bf16 %v595_v6, %v594_v5 }
 0x113   :  { %v341_v21 = vrot.slane %v340_v19, 1  ;;  %v353_v22 = vadd.f32 %v352_v20, %v351_v18  ;;  %1321 = vmatprep.subr.bf16.mxu0 %v1320_v47 }
 0x115   :  { %v354_v23 = vrot.slane %v353_v22, 1  ;;  %v342_v24 = vadd.f32 %v341_v21, %v340_v19  ;;  %v82_v19 = vld [vmem:[%s1897_s3] sm:$0x1] }
 0x116   :  { %1323 = vmatpush3.bf16.msra.mxu0 %v1322_v54 }
 0x117   :  { %v355_v26 = vadd.f32 %v354_v23, %v353_v22  ;;  %v83_v22 = vld [vmem:[%s1897_s3 + $0x1] sm:$0x1]  ;;  %1325 = vmatprep.subr.bf16.mxu0 %v1324_v61 }
 0x119   :  { %v357_v27 = vsel %vm356_vm7, %v342_v24, %v355_v26  ;;  %v598_v26 = vld [vmem:[%s1896_s2 + $0x110] sm:$0xff] }
 0x11a   :  { %1181 = vmatmul.mubr.f32.vlgmr.msra.gmra.mrb[4].mxu1 %v357_v27  ;;  %v599_v27 = vld [vmem:[%s1896_s2 + $0x118] sm:$0xff]  ;;  %1327 = vmatpush3.bf16.msra.mxu0 %v1326_v2 }
 0x11b   :  { %1184 = vmatpush3.msra.mxu1 %v1634_v42  ;;  %1185 = vmatprep.mubr.msk.f32.mxu1 %vm1371_vm6, %v1370_v41  ;;  %v1336_v30 = vpack.c.bf16 %v599_v27, %v598_v26 }
 0x11c   :  { %1333 = vmatprep.subr.bf16.mxu1 %v1332_v39  ;;  %1329 = vmatprep.subr.bf16.mxu0 %v1328_v8 }
 0x1ed   :  { %v424_v9 = vpop.f32.mrb[4].mxu1 }
 0x1ee   :  { %v428_v10 = vmul.f32 0.001953125, %v424_v9  ;;  %v1182_v11 = vpop.f32.mrb[5].mxu1  ;;  %v578_v9 = vld [vmem:[%s1896_s2 + $0x70] sm:$0xff] }
 0x1ef   :  { %v610_v11 = vld [vmem:[%s1896_s2 + $0x170] sm:$0xff] }
 0x1f0   :  { %v429_v12 = vmul.f32 %v428_v10, %v428_v10 }
 0x1f2   :  { %v431_v14 = vrot.slane %v429_v12, 7 }
 0x1f4   :  { %v433_v15 = vsub.f32 %v428_v10, %v431_v14  ;;  %v611_v14 = vld [vmem:[%s1896_s2 + $0x178] sm:$0xff] }
 0x1f6   :  { %v434_v17 = vadd.f32 1e-05, %v433_v15  ;;  %v1360_v15 = vpack.c.bf16 %v611_v14, %v610_v11 }
 0x1f8   :  { %1366 = vrsqrt.f32 %v434_v17  ;;  %v522_v17 = vsub.s32 0, %v1504_v49 }
 0x202   :  { %v1367_v18 = vpop.eup %1366 }
 0x203   :  { %v437_v20 = vrot.slane %v1367_v18, 1  ;;  %v530_v18 = vsub.s32 1, %v1504_v49 }
 0x205   :  { %v439_v21 = vmul.f32 %v437_v20, %v82_v19 }
 0x207   :  { %v440_v23 = vmul.f32 %v439_v21, %v428_v10  ;;  %v579_v10 = vld [vmem:[%s1896_s2 + $0x78] sm:$0xff] }
 0x208   :  { %v1330_v12 = vpack.c.bf16 %v579_v10, %v578_v9 }
 0x209   :  { %v441_v24 = vsub.f32 %v83_v22, %v440_v23 }
 0x20a   :  { %1331 = vmatpush3.bf16.msra.mxu0 %v1330_v12 }
 0x20b   :  { %v443_v28 = vrot.slane %v441_v24, 7  ;;  %1226 = vmatprep.subr.mxu0 %v1370_v41 }
 0x20d   :  { %v445_v31 = vsel %vm356_vm7, %v439_v21, %v443_v28 }
 0x20e   :  { %1186 = vmatmul.mubr.msk.f32.vlgmr.msra.gmra.mrb[6].mxu1 %vm446_vm8, %v445_v31 }
 0x20f   :  { %1335 = vmatpush3.bf16.msra.mxu1 %v1332_v39  ;;  %v605_v39 = vld [vmem:[%s1896_s2 + $0x148] sm:$0xff] }
 0x210   :  { %1337 = vmatprep.subr.bf16.mxu1 %v1336_v30  ;;  %v1348_v44 = vpack.c.bf16 %v605_v39, %v604_v43 }
 0x213   :  { %1339 = vmatpush3.bf16.msra.mxu1 %v1336_v30 }
 0x214   :  { %1341 = vmatprep.subr.bf16.mxu1 %v1340_v34 }
 0x217   :  { %1343 = vmatpush3.bf16.msra.mxu1 %v1340_v34 }
 0x218   :  { %1345 = vmatprep.subr.bf16.mxu1 %v1344_v40 }
 0x21b   :  { %1347 = vmatpush3.bf16.msra.mxu1 %v1344_v40 }
 0x21c   :  { %1349 = vmatprep.subr.bf16.mxu1 %v1348_v44 }
 0x21f   :  { %1351 = vmatpush3.bf16.msra.mxu1 %v1348_v44 }
 0x220   :  { %1353 = vmatprep.subr.bf16.mxu1 %v1352_v58 }
 0x223   :  { %1355 = vmatpush3.bf16.msra.mxu1 %v1352_v58 }
 0x224   :  { %1357 = vmatprep.subr.bf16.mxu1 %v1356_v4 }
 0x227   :  { %1359 = vmatpush3.bf16.msra.mxu1 %v1356_v4 }
 0x228   :  { %1361 = vmatprep.subr.bf16.mxu1 %v1360_v15 }
 0x22b   :  { %1363 = vmatpush3.bf16.msra.mxu1 %v1360_v15 }
 0x2e1   :  { %v516_v19 = vpop.f32.mrb[6].mxu1 }
 0x2e2   :  { %v523_v20 = vrot.slane %v516_v19, %v522_v17  ;;  %v1187_v21 = vpop.f32.mrb[7].mxu1  ;;  %v531_v22 = vrot.slane %v516_v19, %v530_v18 }
 0x2e4   :  { %v525_v23 = vmul.f32 %v523_v20, %v1642_v57  ;;  %v526_v24 = vmul.f32 %v523_v20, %v1646_v62  ;;  %v527_v26 = vmul.f32 %v523_v20, %v1655_v7  ;;  %v524_v27 = vmul.f32 %v523_v20, %v1640_v48 }
 0x2e6   :  { %v533_v28 = vadd.f32 %v531_v22, %v525_v23  ;;  %v534_v30 = vadd.f32 %v531_v22, %v526_v24  ;;  %v535_v31 = vadd.f32 %v531_v22, %v527_v26  ;;  %v532_v32 = vadd.f32 %v531_v22, %v524_v27 }
 0x2e8   :  { %v537_v33 = vmax.f32 %v533_v28, 0.0  ;;  %v538_v34 = vmax.f32 %v534_v30, 0.0  ;;  %v539_v35 = vmax.f32 %v535_v31, 0.0  ;;  %v536_v37 = vmax.f32 %v532_v32, 0.0 }
 0x2ea   :  { %v540_v40 = vrot.slane %v536_v37, 7  ;;  %676 = vmatprep.mubr.f32.mxu0 %v536_v37  ;;  %v543_v43 = vrot.slane %v539_v35, 7  ;;  %v552_v39 = vrot.slane %v536_v37, 1  ;;  %v553_v44 = vrot.slane %v537_v33, 1 }
 0x2eb   :  { %v554_v57 = vrot.slane %v538_v34, 1  ;;  %v555_v45 = vrot.slane %v539_v35, 1  ;;  %v541_v7 = vrot.slane %v537_v33, 7  ;;  %v542_v52 = vrot.slane %v538_v34, 7 }
 0x2ec   :  { %v547_v62 = vsel %vm94_vm1, %v543_v43, %v540_v40  ;;  %v558_v48 = vsel %vm107_vm0, %v552_v39, %v553_v44 }
 0x2ed   :  { %999 = vmatmul.mubr.msk.f32.vlgmr.msra.gmra.mrb[8].mxu0 %vm1584_vm2, %v547_v62  ;;  %1220 = vmatprep.mubr.f32.mxu1 %v558_v48  ;;  %v557_v46 = vsel %vm107_vm0, %v553_v44, %v554_v57  ;;  %v556_v47 = vsel %vm107_vm0, %v554_v57, %v555_v45  ;;  %v546_v50 = vsel %vm94_vm1, %v540_v40, %v541_v7 }
 0x2ee   :  { %681 = vmatprep.mubr.f32.mxu0 %v537_v33  ;;  %1221 = vmatmul.mubr.msk.f32.vlgmr.msra.gmra.mrb[8].mxu1 %vm1592_vm3, %v557_v46  ;;  %v559_v25 = vsel %vm107_vm0, %v555_v45, %v552_v39  ;;  %v545_v29 = vsel %vm94_vm1, %v541_v7, %v542_v52  ;;  %v544_v53 = vsel %vm94_vm1, %v542_v52, %v543_v43  ;;  %v84_v52 = vld [vmem:[%s1897_s3 + $0x2] sm:$0x1] }
 0x2ef   :  { %1223 = vmatprep.mubr.f32.mxu1 %v556_v47  ;;  %1227 = vmatpush3.xpose.msra.mxu0 %v1634_v42 }
 0x2f0   :  { %1231 = vmatprep.subr.mxu0 %v1370_v41 }
 0x2f1   :  { %682 = vmatmul.mubr.f32.gmra.mrb[10].mxu0 %v546_v50 }
 0x2f2   :  { %686 = vmatprep.mubr.f32.mxu0 %v538_v34  ;;  %1224 = vmatmul.mubr.msk.f32.gmra.mrb[10].mxu1 %vm1608_vm4, %v559_v25 }
 0x2f5   :  { %1000 = vmatmul.mubr.msk.f32.gmra.mrb[12].mxu0 %vm1617_vm5, %v545_v29 }
 0x2f6   :  { %691 = vmatprep.mubr.f32.mxu0 %v539_v35 }
 0x2f9   :  { %692 = vmatmul.mubr.f32.gmra.mrb[14].mxu0 %v544_v53 }
 0x2fa   :  { %1228 = vmatprep.mubr.msk.f32.mxu0 %vm1371_vm6, %v1370_v41 }
 0x3c0   :  { %v1104_v54 = vpop.f32.mrb[8].mxu0 }
 0x3c1   :  { %v1105_v56 = vpop.f32.mrb[9].mxu0  ;;  %v1222_v58 = vpop.f32.mrb[8].mxu1 }
 0x3c2   :  { %v1106_v59 = vadd.f32 %v1105_v56, %v1104_v54  ;;  %v763_v36 = vpop.f32.mrb[9].mxu1 }
 0x3c4   :  { %v1855_v60 = vadd.f32 %v1106_v59, %v763_v36  ;;  %v1107_v61 = vpop.f32.mrb[10].mxu0 }
 0x3c5   :  { %v1108_v63 = vpop.f32.mrb[11].mxu0  ;;  %v1225_v0 = vpop.f32.mrb[10].mxu1 }
 0x3c6   :  { %v1109_v38 = vadd.f32 %v1108_v63, %v1107_v61  ;;  %v773_v1 = vpop.f32.mrb[11].mxu1  ;;  %v791_v11 = vmul.f32 %v1855_v60, %v1855_v60 }
 0x3c8   :  { %v769_v2 = vadd.f32 %v1222_v58, %v1109_v38  ;;  %v1110_v3 = vpop.f32.mrb[12].mxu0 }
 0x3c9   :  { %v1111_v4 = vpop.f32.mrb[13].mxu0 }
 0x3ca   :  { %v1112_v5 = vadd.f32 %v1111_v4, %v1110_v3  ;;  %v792_v6 = vmul.f32 %v769_v2, %v769_v2  ;;  %v782_v12 = vadd.f32 %v769_v2, %v1855_v60 }
 0x3cc   :  { %v774_v8 = vadd.f32 %v1112_v5, %v773_v1  ;;  %v1113_v9 = vpop.f32.mrb[14].mxu0  ;;  %v795_v19 = vadd.f32 %v792_v6, %v791_v11 }
 0x3cd   :  { %v1114_v10 = vpop.f32.mrb[15].mxu0 }
 0x3ce   :  { %v793_v14 = vmul.f32 %v774_v8, %v774_v8  ;;  %v1115_v15 = vadd.f32 %v1114_v10, %v1113_v9  ;;  %v783_v20 = vadd.f32 %v782_v12, %v774_v8 }
 0x3d0   :  { %v779_v21 = vadd.f32 %v1225_v0, %v1115_v15  ;;  %v796_v22 = vadd.f32 %v795_v19, %v793_v14 }
 0x3d2   :  { %v784_v23 = vadd.f32 %v783_v20, %v779_v21  ;;  %v794_v24 = vmul.f32 %v779_v21, %v779_v21 }
 0x3d4   :  { %v785_v26 = vrot.slane %v784_v23, 4  ;;  %v797_v27 = vadd.f32 %v796_v22, %v794_v24 }
 0x3d6   :  { %v786_v28 = vadd.f32 %v785_v26, %v784_v23  ;;  %v798_v30 = vrot.slane %v797_v27, 4 }
 0x3d8   :  { %v787_v31 = vrot.slane %v786_v28, 2  ;;  %v799_v32 = vadd.f32 %v798_v30, %v797_v27 }
 0x3da   :  { %v788_v33 = vadd.f32 %v787_v31, %v786_v28  ;;  %v800_v34 = vrot.slane %v799_v32, 2 }
 0x3dc   :  { %v789_v35 = vrot.slane %v788_v33, 1  ;;  %v801_v37 = vadd.f32 %v800_v34, %v799_v32 }
 0x3de   :  { %v802_v40 = vrot.slane %v801_v37, 1  ;;  %v790_v43 = vadd.f32 %v789_v35, %v788_v33 }
 0x3e0   :  { %v803_v39 = vadd.f32 %v802_v40, %v801_v37 }
 0x3e2   :  { %v804_v44 = vsel %vm356_vm7, %v790_v43, %v803_v39 }
 0x3e3   :  { %1229 = vmatmul.mubr.f32.vlgmr.msra.gmra.mrb[16].mxu0 %v804_v44 }
 0x3e4   :  { %1232 = vmatpush3.msra.mxu0 %v1634_v42  ;;  %1233 = vmatprep.mubr.msk.f32.mxu0 %vm1371_vm6, %v1370_v41  ;;  %v85_v42 = vld [vmem:[%s1897_s3 + $0x3] sm:$0x1] }
 0x4b6   :  { %v871_v57 = vpop.f32.mrb[16].mxu0 }
 0x4b7   :  { %v875_v45 = vmul.f32 0.001953125, %v871_v57  ;;  %v1230_v62 = vpop.f32.mrb[17].mxu0 }
 0x4b9   :  { %v876_v48 = vmul.f32 %v875_v45, %v875_v45 }
 0x4bb   :  { %v878_v7 = vrot.slane %v876_v48, 7 }
 0x4bd   :  { %v880_v46 = vsub.f32 %v875_v45, %v878_v7 }
 0x4bf   :  { %v881_v47 = vadd.f32 1e-05, %v880_v46 }
 0x4c1   :  { %1368 = vrsqrt.f32 %v881_v47 }
 0x4cb   :  { %v1369_v50 = vpop.eup %1368 }
 0x4cc   :  { %v884_v25 = vrot.slane %v1369_v50, 1 }
 0x4ce   :  { %v886_v29 = vmul.f32 %v884_v25, %v84_v52 }
 0x4d0   :  { %v887_v41 = vmul.f32 %v886_v29, %v875_v45 }
 0x4d2   :  { %v888_v53 = vsub.f32 %v85_v42, %v887_v41 }
 0x4d4   :  { %v890_v54 = vrot.slane %v888_v53, 7 }
 0x4d6   :  { %v892_v56 = vsel %vm356_vm7, %v886_v29, %v890_v54 }
 0x4d7   :  { %1234 = vmatmul.mubr.msk.f32.vlgmr.msra.gmra.mrb[18].mxu0 %vm446_vm8, %v892_v56 }
 0x5aa   :  { %v962_v58 = vpop.f32.mrb[18].mxu0 }
 0x5ab   :  { %v969_v59 = vrot.slane %v962_v58, %v522_v17  ;;  %v1235_v36 = vpop.f32.mrb[19].mxu0  ;;  %v977_v61 = vrot.slane %v962_v58, %v530_v18 }
 0x5ad   :  { %v970_v63 = vmul.f32 %v969_v59, %v1855_v60  ;;  %v971_v0 = vmul.f32 %v969_v59, %v769_v2  ;;  %v972_v38 = vmul.f32 %v969_v59, %v774_v8  ;;  %v973_v1 = vmul.f32 %v969_v59, %v779_v21 }
 0x5af   :  { %v978_v3 = vadd.f32 %v977_v61, %v970_v63  ;;  %v979_v4 = vadd.f32 %v977_v61, %v971_v0  ;;  %v980_v5 = vadd.f32 %v977_v61, %v972_v38  ;;  %v981_v6 = vadd.f32 %v977_v61, %v973_v1 }
 0x5b1   :  { %v982_v9 = vadd.f32 %v978_v3, %v1509_v51  ;;  %v983_v10 = vadd.f32 %v979_v4, %v1520_v55  ;;  %v984_v11 = vadd.f32 %v980_v5, %v1575_v16  ;;  %v985_v17 = vadd.f32 %v981_v6, %v1569_v13 }
 0x5b3   :  { %986 = vst [vmem:[%s1898_s5] sm:$0xff] %v982_v9  ;;  %987 = vst [vmem:[%s1898_s5 + $0x8] sm:$0xff] %v983_v10 }
 0x5b4   :  { %988 = vst [vmem:[%s1898_s5 + $0x10] sm:$0xff] %v984_v11  ;;  %989 = vst [vmem:[%s1898_s5 + $0x18] sm:$0xff] %v985_v17 }

</bundles_post_ra>
